<compile_context>
chip_gen: v6e
topology: v6e:2x2x1
jax: 0.10.0
libtpu: 0.0.40
codegen_flags: <defaults>
</compile_context>

<pallas_src>
import jax
import jax.numpy as jnp
from jax.experimental import pallas as pl
from jax.experimental.pallas import tpu as pltpu


def _round_up(x, m):
    return ((x + m - 1) // m) * m


def cls_head_kernel(x_ref, w1_ref, b1_ref, w2_ref, b2_ref, out_ref):
    # x_ref: [TB, H] bf16 CLS activations for this batch tile.
    x = x_ref[...]

    # dense: bf16 MXU matmul, f32 accumulate, f32 bias add.
    h = jnp.dot(x, w1_ref[...], preferred_element_type=jnp.float32) + b1_ref[...]
    # tanh in f32 (EUP slot; keeps v5e happy, which lacks bf16 EUP).
    h = jnp.tanh(h)

    # out_proj: cast back to bf16 for the MXU, f32 accumulate + f32 bias.
    h = h.astype(w2_ref.dtype)
    out = jnp.dot(h, w2_ref[...], preferred_element_type=jnp.float32) + b2_ref[...]
    out_ref[...] = out.astype(out_ref.dtype)


def roberta_classification_head(features, w_dense, b_dense, w_out, b_out):
    """Forward pass of RobertaClassificationHead (eval mode, dropout = id).

    features: [B, S, H] float32
    w_dense:  [H, H]   (pre-transposed: in x out)
    b_dense:  [1, H]
    w_out:    [H, L]   (pre-transposed: in x out)
    b_out:    [1, L]
    returns:  [B, L] float32
    """
    B, S, H = features.shape
    L = w_out.shape[1]

    # --- CLS slice outside the kernel: only [B, H] ever touches VMEM. ---
    x = features[:, 0, :]

    # --- Batch tiling: TB rows per grid step (multiple of 8 sublanes). ---
    TB = min(128, _round_up(B, 8))
    B_pad = _round_up(B, TB)
    if B_pad != B:
        x = jnp.pad(x, ((0, B_pad - B), (0, 0)))

    # --- Pad label dim to 128 for a lane-dense output / MXU tile. ---
    L_pad = _round_up(L, 128)
    if L_pad != L:
        w_out = jnp.pad(w_out, ((0, 0), (0, L_pad - L)))
        b_out = jnp.pad(b_out, ((0, 0), (0, L_pad - L)))

    # --- bf16 operands for the MXU; biases stay f32 (post-accumulation). ---
    x_bf = x.astype(jnp.bfloat16)
    w1_bf = w_dense.astype(jnp.bfloat16)
    w2_bf = w_out.astype(jnp.bfloat16)
    b1_f32 = b_dense.astype(jnp.float32)
    b2_f32 = b_out.astype(jnp.float32)

    out_padded = pl.pallas_call(
        cls_head_kernel,
        out_shape=jax.ShapeDtypeStruct((B_pad, L_pad), jnp.float32),
        grid_spec=pltpu.PrefetchScalarGridSpec(
            num_scalar_prefetch=0,
            grid=(B_pad // TB,),
            in_specs=[
                pl.BlockSpec((TB, H), lambda i: (i, 0)),      # CLS tile (streamed)
                pl.BlockSpec((H, H), lambda i: (0, 0)),       # w_dense (VMEM-resident)
                pl.BlockSpec((1, H), lambda i: (0, 0)),       # b_dense (resident)
                pl.BlockSpec((H, L_pad), lambda i: (0, 0)),   # w_out   (resident)
                pl.BlockSpec((1, L_pad), lambda i: (0, 0)),   # b_out   (resident)
            ],
            out_specs=pl.BlockSpec((TB, L_pad), lambda i: (i, 0)),
        ),
        compiler_params=pltpu.CompilerParams(
            dimension_semantics=("parallel",),  # batch tiles shard across TCs on v7x
        ),
    )(x_bf, w1_bf, b1_f32, w2_bf, b2_f32)

    # Strip batch + label padding.
    return out_padded[:B, :L]


def reference(features, w_dense, b_dense, w_out, b_out):
    x = features[:, 0, :]
    h = jnp.tanh(x @ w_dense + b_dense)
    return h @ w_out + b_out


if __name__ == "__main__":
    # Small, module-consistent shapes: batch=2, seq=8, hidden=32, num_labels=4.
    B, S, H, L = 2, 8, 32, 4

    key = jax.random.PRNGKey(0)
    k_feat, k_w1, k_b1, k_w2, k_b2 = jax.random.split(key, 5)

    features = jax.random.normal(k_feat, (B, S, H), dtype=jnp.float32)
    # Deterministic synthetic parameters (stand-in for nn.Linear weights).
    w_dense = jax.random.normal(k_w1, (H, H), dtype=jnp.float32) * 0.02
    b_dense = jax.random.normal(k_b1, (1, H), dtype=jnp.float32) * 0.02
    w_out = jax.random.normal(k_w2, (H, L), dtype=jnp.float32) * 0.02
    b_out = jax.random.normal(k_b2, (1, L), dtype=jnp.float32) * 0.02

    out = roberta_classification_head(features, w_dense, b_dense, w_out, b_out)
    out = jax.block_until_ready(out)

    ref = reference(features, w_dense, b_dense, w_out, b_out)
    assert out.shape == (B, L), f"bad output shape {out.shape}"
    # bf16 MXU operands with f32 accumulation -> loosened tolerance vs f32 ref.
    assert jnp.allclose(out, ref, atol=2e-2, rtol=2e-2), (
        f"max abs err {jnp.max(jnp.abs(out - ref))}"
    )

    print("KERNEL_OK")
</pallas_src>

<mosaic_0001>
module attributes {stable_mosaic.version = 11 : i64} {
  func.func @cls_head_kernel(%arg0: i32, %arg1: memref<8x32xbf16, #tpu.memory_space<vmem>>, %arg2: memref<32x32xbf16, #tpu.memory_space<vmem>>, %arg3: memref<1x32xf32, #tpu.memory_space<vmem>>, %arg4: memref<32x128xbf16, #tpu.memory_space<vmem>>, %arg5: memref<1x128xf32, #tpu.memory_space<vmem>>, %arg6: memref<8x128xf32, #tpu.memory_space<vmem>>) attributes {dimension_semantics = [#tpu.dimension_semantics<parallel>], iteration_bounds = array<i64: 1>, scalar_prefetch = 0 : i64, scratch_operands = 0 : i64, tpu.core_type = #tpu.core_type<tc>, window_params = [{transform_indices = @transform_0, window_bounds = array<i64: 8, 32>}, {pipeline_mode = #tpu.pipeline_mode<synchronous>, transform_indices = @transform_1, window_bounds = array<i64: 32, 32>}, {pipeline_mode = #tpu.pipeline_mode<synchronous>, transform_indices = @transform_2, window_bounds = array<i64: 1, 32>}, {pipeline_mode = #tpu.pipeline_mode<synchronous>, transform_indices = @transform_3, window_bounds = array<i64: 32, 128>}, {pipeline_mode = #tpu.pipeline_mode<synchronous>, transform_indices = @transform_4, window_bounds = array<i64: 1, 128>}, {transform_indices = @transform_5, window_bounds = array<i64: 8, 128>}]} {
    %c0 = arith.constant 0 : index
    %c0_0 = arith.constant 0 : index
    %0 = vector.load %arg1[%c0, %c0_0] : memref<8x32xbf16, #tpu.memory_space<vmem>>, vector<8x32xbf16>
    %c0_1 = arith.constant 0 : index
    %c0_2 = arith.constant 0 : index
    %1 = vector.load %arg2[%c0_1, %c0_2] : memref<32x32xbf16, #tpu.memory_space<vmem>>, vector<32x32xbf16>
    %cst = arith.constant dense<0.000000e+00> : vector<8x32xf32>
    %2 = tpu.matmul %0, %1, %cst {dimension_numbers = #tpu.dot_dimension_numbers<[1], [0], [0], [1], [0, 0, 1, 1], [], []>} : vector<8x32xbf16>, vector<32x32xbf16>, vector<8x32xf32> -> vector<8x32xf32>
    %c0_3 = arith.constant 0 : index
    %c0_4 = arith.constant 0 : index
    %3 = vector.load %arg3[%c0_3, %c0_4] : memref<1x32xf32, #tpu.memory_space<vmem>>, vector<1x32xf32>
    %4 = vector.broadcast %3 : vector<1x32xf32> to vector<8x32xf32>
    %5 = arith.addf %2, %4 : vector<8x32xf32>
    %6 = math.tanh %5 : vector<8x32xf32>
    %7 = arith.truncf %6 : vector<8x32xf32> to vector<8x32xbf16>
    %c0_5 = arith.constant 0 : index
    %c0_6 = arith.constant 0 : index
    %8 = vector.load %arg4[%c0_5, %c0_6] : memref<32x128xbf16, #tpu.memory_space<vmem>>, vector<32x128xbf16>
    %cst_7 = arith.constant dense<0.000000e+00> : vector<8x128xf32>
    %9 = tpu.matmul %7, %8, %cst_7 {dimension_numbers = #tpu.dot_dimension_numbers<[1], [0], [0], [1], [0, 0, 1, 1], [], []>} : vector<8x32xbf16>, vector<32x128xbf16>, vector<8x128xf32> -> vector<8x128xf32>
    %c0_8 = arith.constant 0 : index
    %c0_9 = arith.constant 0 : index
    %10 = vector.load %arg5[%c0_8, %c0_9] : memref<1x128xf32, #tpu.memory_space<vmem>>, vector<1x128xf32>
    %11 = vector.broadcast %10 : vector<1x128xf32> to vector<8x128xf32>
    %12 = arith.addf %9, %11 : vector<8x128xf32>
    %c0_10 = arith.constant 0 : index
    %c0_11 = arith.constant 0 : index
    %13 = vector.load %arg6[%c0_10, %c0_11] : memref<8x128xf32, #tpu.memory_space<vmem>>, vector<8x128xf32>
    tpu.vector_store %arg6[%c0_10, %c0_11], %12 {strides = array<i32>} : memref<8x128xf32, #tpu.memory_space<vmem>>, vector<8x128xf32>,
    return
  }
  func.func @transform_0(%arg0: i32) -> (i32, i32) {
    %c0_i32 = arith.constant 0 : i32
    %c0_i32_0 = arith.constant 0 : i32
    return %arg0, %c0_i32 : i32, i32
  }
  func.func @transform_1(%arg0: i32) -> (i32, i32) {
    %c0_i32 = arith.constant 0 : i32
    %c0_i32_0 = arith.constant 0 : i32
    %c0_i32_1 = arith.constant 0 : i32
    return %c0_i32, %c0_i32_0 : i32, i32
  }
  func.func @transform_2(%arg0: i32) -> (i32, i32) {
    %c0_i32 = arith.constant 0 : i32
    %c0_i32_0 = arith.constant 0 : i32
    %c0_i32_1 = arith.constant 0 : i32
    return %c0_i32, %c0_i32_0 : i32, i32
  }
  func.func @transform_3(%arg0: i32) -> (i32, i32) {
    %c0_i32 = arith.constant 0 : i32
    %c0_i32_0 = arith.constant 0 : i32
    %c0_i32_1 = arith.constant 0 : i32
    return %c0_i32, %c0_i32_0 : i32, i32
  }
  func.func @transform_4(%arg0: i32) -> (i32, i32) {
    %c0_i32 = arith.constant 0 : i32
    %c0_i32_0 = arith.constant 0 : i32
    %c0_i32_1 = arith.constant 0 : i32
    return %c0_i32, %c0_i32_0 : i32, i32
  }
  func.func @transform_5(%arg0: i32) -> (i32, i32) {
    %c0_i32 = arith.constant 0 : i32
    %c0_i32_0 = arith.constant 0 : i32
    return %arg0, %c0_i32 : i32, i32
  }
}

</mosaic_0001>

<bundles_post_ra>
// kernel: tpu_custom_call.1
= control target key start
LH: loop header
LB: loop body
LE: loop exit
PB: predicated region body
PF: predicated region fallthrough
CT: control target
= control target key end

     0   :  { %10 = vsyncpa [#allocation3], 0  ;;  %s402_s0 = inlined_call_operand.hbm [shape: bf16[8,32], index: 0, kind: input, shape index: {}]   ;;  %s403_s1 = inlined_call_operand.hbm [shape: bf16[32,32], index: 1, kind: input, shape index: {}]   ;;  %s404_s2 = inlined_call_operand.vmem [shape: f32[1,32], index: 2, kind: input, shape index: {}]   ;;  %s405_s3 = inlined_call_operand.hbm [shape: bf16[32,128], index: 3, kind: input, shape index: {}]   ;;  %s406_s4 = inlined_call_operand.vmem [shape: f32[1,128], index: 4, kind: input, shape index: {}]   ;;  %s407_s5 = inlined_call_operand.hbm [shape: f32[8,128], index: 5, kind: output, shape index: {}]  }
   0x1   :  { %11 = vsyncpa [#allocation6], 0 }
   0x2   :  { %12 = vsyncpa [#allocation4], 0  ;;  %s344_s18 = smov [#allocation5]  }
   0x3   :  { %s28_s19 = sshll.u32 %s344_s18, 4  ;;  %s29_s19 = int_to_ptr.vmem [resolvable:$true] %s28_s19 }
   0x4   :  { %s266_s20 = scalar_lea.vmem %s29_s19, 256  ;;  %p271_p1 = scmp.lt.s32.totalorder %s29_s19, %s29_s19 }
   0x5   :  { %p267_p0 = scmp.ne.s32.totalorder %s29_s19, %s266_s20  ;;  %p272_p2 = scmp.lt.s32.totalorder %s266_s20, %s266_s20 }
   0x7   :  { %p273_p3 = por %p272_p2, %p271_p1 }
   0x9   :  { %p274_p4 = pnand %p273_p3, %p267_p0 }
   0xb   :  { %277 = shalt.err (!%p274_p4)
}
   0xc   :  { %s345_s21 = smov 64   ;;  %s346_s22 = smov 4  }
   0xd   :  { %34 = dma.hbm_to_vmem [thread:$0]  %s403_s1, 256, %s29_s19, [#allocation6], %s345_s21, %s345_s21, %s346_s22  }
   0xe   :  { %s347_s25 = smov [#allocation2]   ;;  %s348_s27 = smov [#allocation7]  }
   0xf   :  { %s19_s26 = sshll.u32 %s347_s25, 4  ;;  %s42_s28 = sshll.u32 %s348_s27, 4  ;;  %s20_s26 = int_to_ptr.vmem [resolvable:$true] %s19_s26  ;;  %s43_s28 = int_to_ptr.vmem [resolvable:$true] %s42_s28 }
  0x10   :  { %s286_s29 = scalar_lea.vmem %s20_s26, 64  ;;  %p291_p6 = scmp.lt.s32.totalorder %s20_s26, %s20_s26 }
  0x11   :  { %p287_p5 = scmp.ne.s32.totalorder %s20_s26, %s286_s29  ;;  %p292_p7 = scmp.lt.s32.totalorder %s286_s29, %s286_s29 }
  0x13   :  { %p293_p8 = por %p292_p7, %p291_p6 }
  0x15   :  { %p294_p9 = pnand %p293_p8, %p287_p5 }
  0x17   :  { %297 = shalt.err (!%p294_p9)
}
  0x18   :  { %22 = dma.hbm_to_vmem [thread:$0]  %s402_s0, 64, %s20_s26, [#allocation3]  }
  0x19   :  { %s306_s7 = scalar_lea.vmem %s43_s28, 256  ;;  %p311_p11 = scmp.lt.s32.totalorder %s43_s28, %s43_s28 }
  0x1a   :  { %p307_p10 = scmp.ne.s32.totalorder %s43_s28, %s306_s7  ;;  %p312_p12 = scmp.lt.s32.totalorder %s306_s7, %s306_s7 }
  0x1c   :  { %p313_p13 = por %p312_p12, %p311_p11 }
  0x1e   :  { %p314_p0 = pnand %p313_p13, %p307_p10 }
  0x20   :  { %317 = shalt.err (!%p314_p0)
}
  0x21   :  { %48 = dma.hbm_to_vmem [thread:$0]  %s405_s3, 256, %s43_s28, [#allocation6], %s345_s21, %s345_s21, %s346_s22  }
  0x22   :  { %338 = dma.done.wait [#allocation3], 64  }
  0x23   :  { %339 = vsyncadd [#allocation3], 4294967232 }
  0x24   :  { %340 = dma.done.wait [#allocation6], 512  }
  0x25   :  { %341 = vsyncadd [#allocation6], 4294966784  ;;  %v349_v0 = vmov 0.0   ;;  %vm350_vm0 = vmmov 0   ;;  %v252_v1 = vld [vmem:[#allocation5 + $0x8] sm:$0xff]   ;;  %v253_v2 = vld [vmem:[#allocation5] sm:$0xff]  }
  0x26   :  { %228 = vmatprep.subr.bf16.mxu0 %v349_v0  ;;  %232 = vmatprep.mubr.msk.bf16.mxu0 %vm350_vm0, %v349_v0  ;;  %v61_v3 = vld [vmem:[#allocation2] sm:$0xf]  ;;  %vm85_vm1 = vcmask 261120   ;;  %v255_v5 = vld [vmem:[#allocation7] sm:$0xff]   ;;  %s351_s11 = smov [#allocation8]  }
  0x27   :  { %236 = vmatprep.subr.bf16.mxu1 %v349_v0  ;;  %240 = vmatprep.mubr.msk.bf16.mxu1 %vm350_vm0, %v349_v0  ;;  %v254_v4 = vld [vmem:[#allocation7 + $0x8] sm:$0xff]   ;;  %s204_s12 = sshll.u32 %s351_s11, 4  ;;  %s205_s12 = int_to_ptr.vmem [resolvable:$true] %s204_s12 }
  0x28   :  { %229 = vmatpush3.bf16.msra.mxu0 %v252_v1  ;;  %237 = vmatpush3.bf16.msra.mxu1 %v254_v4  ;;  %v214_v6 = vld [vmem:[%s404_s2] ss:$0 sm:$0xff]  ;;  %s318_s2 = scalar_lea.vmem %s205_s12, 128  ;;  %p323_p2 = scmp.lt.s32.totalorder %s205_s12, %s205_s12 }
  0x29   :  { %230 = vmatprep.subr.bf16.mxu0 %v349_v0  ;;  %238 = vmatprep.subr.bf16.mxu1 %v349_v0  ;;  %v218_v14 = vld [vmem:[%s406_s4] ss:$0 sm:$0xff]  ;;  %p319_p1 = scmp.ne.s32.totalorder %s205_s12, %s318_s2  ;;  %p324_p3 = scmp.lt.s32.totalorder %s318_s2, %s318_s2 }
  0x2b   :  { %p325_p4 = por %p324_p3, %p323_p2 }
  0x2c   :  { %231 = vmatpush3.bf16.msra.mxu0 %v253_v2  ;;  %239 = vmatpush3.bf16.msra.mxu1 %v255_v5 }
  0x2d   :  { %p326_p5 = pnand %p325_p4, %p319_p1 }
  0x2f   :  { %233 = vmatmul.mubr.msk.bf16.vlgmr.msra.gmra.mxu0 %vm85_vm1, %v61_v3 }
  0xef   :  { %v123_v7 = vpop.f32.mrf.mxu0 }
  0xf0   :  { %v124_v8 = vadd.f32 %v214_v6, %v123_v7 }
  0xf1   :  { %v234_v9 = vpop.f32.mrf.mxu0 }
  0xf2   :  { %256 = vtanh.f32 %v124_v8 }
  0xf3   :  { %v126_v10 = vpop.f32.mrf.mxu0 }
  0xf5   :  { %v235_v11 = vpop.f32.mrf.mxu0 }
  0xff   :  { %v257_v12 = vpop.eup %256 }
 0x100   :  { %v130_v13 = vpack.c.bf16 %v257_v12, %v257_v12 }
 0x102   :  { %241 = vmatmul.mubr.msk.bf16.vlgmr.msra.gmra.mxu1 %vm85_vm1, %v130_v13 }
 0x1c2   :  { %v191_v15 = vpop.f32.mrf.mxu1 }
 0x1c3   :  { %v192_v16 = vadd.f32 %v218_v14, %v191_v15 }
 0x1c4   :  { %v242_v17 = vpop.f32.mrf.mxu1 }
 0x1c5   :  { %197 = vst [vmem:[#allocation8] sm:$0xff] %v192_v16 }
 0x1c6   :  { %v194_v18 = vpop.f32.mrf.mxu1 }
 0x1c7   :  { %329 = shalt.err (!%p326_p5)
}
 0x1c8   :  { %207 = dma.vmem_to_hbm [thread:$0]  %s205_s12, 128, %s407_s5, [#allocation4]   ;;  %v243_v19 = vpop.f32.mrf.mxu1 }
 0x1c9   :  { %342 = dma.done.wait [#allocation4], 128  }
 0x1ca   :  { %343 = vsyncadd [#allocation4], 4294967168 }
 0x1cb   :  { %211 = vsyncpa [#allocation3], 1 }
 0x1cc   :  { %212 = vsyncpa [#allocation6], 1 }
 0x1cd   :  { %213 = vsyncpa [#allocation4], 1 }

</bundles_post_ra>
